<compile_context>
chip_gen: v7x
topology: tpu7x:2x2x1
jax: 0.10.0
libtpu: 0.0.40
codegen_flags: <defaults>
</compile_context>

<pallas_src>
import jax
import jax.numpy as jnp
from jax import lax
from jax.experimental import pallas as pl
from jax.experimental.pallas import tpu as pltpu


# Contract the seq (row) axes of K and V -> K^T @ V, no explicit transpose.
_KT_V = (((0,), (0,)), ((), ()))


# --------------------------------------------------------------------------
# Kernels
# --------------------------------------------------------------------------
def _kv_kernel(x_ref, wk_ref, wv_ref, kv_ref):
    """Accumulate a partial KV = K^T @ V over the inner (reduction) grid axis.

    Grid is (n_split, tiles_per_split); kv_ref is the resident accumulator for
    the current split (same output block for every inner step)."""
    @pl.when(pl.program_id(1) == 0)
    def _():
        kv_ref[...] = jnp.zeros_like(kv_ref)

    x = x_ref[...]
    k = jnp.dot(x, wk_ref[...], preferred_element_type=jnp.float32)   # (tq, do)
    v = jnp.dot(x, wv_ref[...], preferred_element_type=jnp.float32)   # (tq, do)
    kv_ref[...] += lax.dot_general(k, v, _KT_V,
                                   preferred_element_type=jnp.float32)


def _kv_q_kernel(x_ref, wk_ref, wv_ref, wq_ref, kv_ref, q_ref):
    """Same as _kv_kernel, but also emits Q from the already-loaded x tile so
    pass 2 does not have to re-read x from HBM (used when d_in >> d_out)."""
    @pl.when(pl.program_id(1) == 0)
    def _():
        kv_ref[...] = jnp.zeros_like(kv_ref)

    x = x_ref[...]
    k = jnp.dot(x, wk_ref[...], preferred_element_type=jnp.float32)
    v = jnp.dot(x, wv_ref[...], preferred_element_type=jnp.float32)
    q_ref[...] = jnp.dot(x, wq_ref[...],
                         preferred_element_type=jnp.float32).astype(q_ref.dtype)
    kv_ref[...] += lax.dot_general(k, v, _KT_V,
                                   preferred_element_type=jnp.float32)


def _ctx_from_x_kernel(x_ref, wq_ref, kv_ref, o_ref):
    """out_tile = (x_tile @ W_q) @ KV  -- each seq tile independent."""
    q = jnp.dot(x_ref[...], wq_ref[...], preferred_element_type=jnp.float32)
    o_ref[...] = jnp.dot(q, kv_ref[...],
                         preferred_element_type=jnp.float32).astype(o_ref.dtype)
    # NOTE: the reference computes softmax(S / sqrt(d_k)) into `attn_weight`
    # but never uses it; it is dead code and intentionally omitted.


def _ctx_from_q_kernel(q_ref, kv_ref, o_ref):
    """out_tile = q_tile @ KV  (Q was produced by pass 1)."""
    o_ref[...] = jnp.dot(q_ref[...], kv_ref[...],
                         preferred_element_type=jnp.float32).astype(o_ref.dtype)


# --------------------------------------------------------------------------
# Wrapper-side sizing helpers
# --------------------------------------------------------------------------
def _round_up(n, m):
    return ((n + m - 1) // m) * m


def _vmem_capacity_bytes():
    """Per-core VMEM capacity; conservative v7x (64 MiB) fallback."""
    try:
        info = pltpu.get_tpu_info()
        cap = getattr(info, "vmem_capacity_bytes", None)
        if cap:
            return int(cap)
    except Exception:
        pass
    return 64 * 1024 * 1024


def _select_tile_and_vmem(seq, d_in_p, d_out_p, emit_q):
    """Pick the seq tile size tq from a VMEM byte budget and return an
    explicit vmem_limit_bytes sized from the resulting footprint."""
    f32 = 4
    cap = _vmem_capacity_bytes()
    budget = cap // 2                      # leave headroom for Mosaic scratch

    # Resident per-call footprint (pipeline buffers counted at 2 per operand).
    w_bytes = d_in_p * d_out_p * f32 * 2                   # one weight, 2 bufs
    kv_bytes = d_out_p * d_out_p * f32 * 2                 # KV block, 2 bufs
    fixed_p1 = w_bytes * (3 if emit_q else 2) + kv_bytes
    fixed_p2 = (0 if emit_q else w_bytes) + kv_bytes
    fixed = max(fixed_p1, fixed_p2)

    # Per-seq-row streaming footprint (double-buffered tiles + f32 temps).
    per_row_p1 = f32 * (2 * d_in_p                         # x tile, 2 bufs
                        + 2 * d_out_p                      # k, v f32 temps
                        + (3 * d_out_p if emit_q else 0))  # q temp + q out
    in_feat_p2 = d_out_p if emit_q else d_in_p
    per_row_p2 = f32 * (2 * in_feat_p2                     # x-or-q tile
                        + 2 * d_out_p                      # out tile, 2 bufs
                        + (0 if emit_q else d_out_p))      # q temp
    per_row = max(per_row_p1, per_row_p2)

    tq = (budget - fixed) // per_row if budget > fixed else 8
    tq = max(8, min(int(tq), 8192, _round_up(seq, 8)))     # grow past 1024 when
    tq = (tq // 8) * 8                                     # d is small; mult of 8

    footprint = fixed + per_row * tq
    vmem_limit = int(min(cap * 3 // 4,
                         max(footprint * 3 // 2, 32 * 1024 * 1024)))
    return tq, vmem_limit


# --------------------------------------------------------------------------
# Public entry point
# --------------------------------------------------------------------------
def self_attention_v2(x, w_q, w_k, w_v):
    """x: (seq, d_in); w_*: PyTorch-style (d_out, d_in) Linear weights."""
    seq, d_in = x.shape
    d_out = w_q.shape[0]

    # Lane-dense padding: both feature dims padded to multiples of 128.
    d_in_p = _round_up(d_in, 128)
    d_out_p = _round_up(d_out, 128)

    # Only pay the extra Q HBM round-trip when it is a net traffic win.
    emit_q = d_in_p > 2 * d_out_p

    tq, vmem_limit = _select_tile_and_vmem(seq, d_in_p, d_out_p, emit_q)

    # One-time wrapper-side transpose+pad of the (small) weights to
    # (d_in_p, d_out_p): in-kernel projections are plain matmuls (no per-step
    # XLU transposes of large tiles).
    def _pad_w(w):
        return jnp.pad(w.T, ((0, d_in_p - d_in), (0, d_out_p - d_out)))

    wq_t, wk_t, wv_t = _pad_w(w_q), _pad_w(w_k), _pad_w(w_v)

    # Pad seq up to a tile multiple (zero rows contribute nothing to K^T@V and
    # their output rows are sliced off) instead of a giant full-extent block.
    n_tiles = -(-seq // tq)
    # Split the pass-1 reduction into 2 partial accumulations on a leading
    # "parallel" axis (both TensorCores on v7x). Only when the extra padded
    # zero-tile (odd tile counts) is cheap relative to the real work.
    n_split = 2 if (n_tiles >= 2 and (n_tiles % 2 == 0 or n_tiles >= 8)) else 1
    tiles_per_split = -(-n_tiles // n_split)
    seq_p = tiles_per_split * n_split * tq
    x_p = jnp.pad(x, ((0, seq_p - seq), (0, d_in_p - d_in)))

    # ----------------------- pass 1: partial KV = K^T @ V ------------------
    x_spec1 = pl.BlockSpec((tq, d_in_p),
                           lambda c, i: (c * tiles_per_split + i, 0))
    w_spec1 = pl.BlockSpec((d_in_p, d_out_p), lambda c, i: (0, 0))
    kv_spec1 = pl.BlockSpec((None, d_out_p, d_out_p), lambda c, i: (c, 0, 0))

    if emit_q:
        kernel1 = _kv_q_kernel
        in_specs1 = [x_spec1, w_spec1, w_spec1, w_spec1]
        args1 = (x_p, wk_t, wv_t, wq_t)
        out_shape1 = (
            jax.ShapeDtypeStruct((n_split, d_out_p, d_out_p), jnp.float32),
            jax.ShapeDtypeStruct((seq_p, d_out_p), jnp.float32),
        )
        out_specs1 = (
            kv_spec1,
            pl.BlockSpec((tq, d_out_p),
                         lambda c, i: (c * tiles_per_split + i, 0)),
        )
    else:
        kernel1 = _kv_kernel
        in_specs1 = [x_spec1, w_spec1, w_spec1]
        args1 = (x_p, wk_t, wv_t)
        out_shape1 = jax.ShapeDtypeStruct((n_split, d_out_p, d_out_p),
                                          jnp.float32)
        out_specs1 = kv_spec1

    res1 = pl.pallas_call(
        kernel1,
        out_shape=out_shape1,
        grid_spec=pltpu.PrefetchScalarGridSpec(
            num_scalar_prefetch=0,
            grid=(n_split, tiles_per_split),
            in_specs=in_specs1,
            out_specs=out_specs1,
        ),
        compiler_params=pltpu.CompilerParams(
            dimension_semantics=("parallel", "arbitrary"),
            vmem_limit_bytes=vmem_limit),
    )(*args1)

    if emit_q:
        kv_partials, q_p = res1
    else:
        kv_partials, q_p = res1, None
    kv = jnp.sum(kv_partials, axis=0)          # tiny (d_out_p, d_out_p) reduce

    # ----------------------- pass 2: out = Q @ KV --------------------------
    grid2 = (seq_p // tq,)
    kv_spec2 = pl.BlockSpec((d_out_p, d_out_p), lambda i: (0, 0))
    out_spec2 = pl.BlockSpec((tq, d_out_p), lambda i: (i, 0))

    if emit_q:
        kernel2 = _ctx_from_q_kernel
        in_specs2 = [pl.BlockSpec((tq, d_out_p), lambda i: (i, 0)), kv_spec2]
        args2 = (q_p, kv)
    else:
        kernel2 = _ctx_from_x_kernel
        in_specs2 = [pl.BlockSpec((tq, d_in_p), lambda i: (i, 0)),
                     pl.BlockSpec((d_in_p, d_out_p), lambda i: (0, 0)),
                     kv_spec2]
        args2 = (x_p, wq_t, kv)

    out_p = pl.pallas_call(
        kernel2,
        out_shape=jax.ShapeDtypeStruct((seq_p, d_out_p), x.dtype),
        grid_spec=pltpu.PrefetchScalarGridSpec(
            num_scalar_prefetch=0,
            grid=grid2,
            in_specs=in_specs2,
            out_specs=out_spec2,
        ),
        compiler_params=pltpu.CompilerParams(
            dimension_semantics=("parallel",),
            vmem_limit_bytes=vmem_limit),
    )(*args2)

    return out_p[:seq, :d_out]


# --------------------------------------------------------------------------
# Pure-JAX reference (matches the PyTorch module: NO softmax on the returned
# path -- attn_weight is dead code).
# --------------------------------------------------------------------------
def _reference(x, w_q, w_k, w_v):
    q = x @ w_q.T
    k = x @ w_k.T
    v = x @ w_v.T
    s = q @ k.T
    return s @ v


if __name__ == "__main__":
    seq, d_in, d_out = 8, 32, 32

    key = jax.random.PRNGKey(0)
    kx, kq, kk, kv_key = jax.random.split(key, 4)

    x = jax.random.normal(kx, (seq, d_in), dtype=jnp.float32)
    # deterministic PyTorch-Linear-style init: U(-1/sqrt(d_in), 1/sqrt(d_in))
    bound = 1.0 / (d_in ** 0.5)
    w_q = jax.random.uniform(kq, (d_out, d_in), jnp.float32, -bound, bound)
    w_k = jax.random.uniform(kk, (d_out, d_in), jnp.float32, -bound, bound)
    w_v = jax.random.uniform(kv_key, (d_out, d_in), jnp.float32, -bound, bound)

    attn = jax.jit(self_attention_v2)
    out = jax.block_until_ready(attn(x, w_q, w_k, w_v))

    ref = _reference(x, w_q, w_k, w_v)
    assert out.shape == (seq, d_out)
    # ((QK^T)V == Q(K^T V)) reassociation only changes f32 summation order.
    assert jnp.allclose(out, ref, atol=2e-3, rtol=2e-4), (
        float(jnp.max(jnp.abs(out - ref))))

    print("KERNEL_OK")
</pallas_src>

<mosaic_0001>
module attributes {stable_mosaic.version = 11 : i64} {
  func.func @_ctx_from_x_kernel(%arg0: i32, %arg1: memref<8x128xf32, #tpu.memory_space<vmem>>, %arg2: memref<128x128xf32, #tpu.memory_space<vmem>>, %arg3: memref<128x128xf32, #tpu.memory_space<vmem>>, %arg4: memref<8x128xf32, #tpu.memory_space<vmem>>) attributes {dimension_semantics = [#tpu.dimension_semantics<parallel>], iteration_bounds = array<i64: 1>, scalar_prefetch = 0 : i64, scratch_operands = 0 : i64, tpu.core_type = #tpu.core_type<tc>, window_params = [{transform_indices = @transform_0, window_bounds = array<i64: 8, 128>}, {pipeline_mode = #tpu.pipeline_mode<synchronous>, transform_indices = @transform_1, window_bounds = array<i64: 128, 128>}, {pipeline_mode = #tpu.pipeline_mode<synchronous>, transform_indices = @transform_2, window_bounds = array<i64: 128, 128>}, {transform_indices = @transform_3, window_bounds = array<i64: 8, 128>}]} {
    %c0 = arith.constant 0 : index
    %c0_0 = arith.constant 0 : index
    %0 = vector.load %arg1[%c0, %c0_0] : memref<8x128xf32, #tpu.memory_space<vmem>>, vector<8x128xf32>
    %c0_1 = arith.constant 0 : index
    %c0_2 = arith.constant 0 : index
    %1 = vector.load %arg2[%c0_1, %c0_2] : memref<128x128xf32, #tpu.memory_space<vmem>>, vector<128x128xf32>
    %cst = arith.constant dense<0.000000e+00> : vector<8x128xf32>
    %2 = tpu.matmul %0, %1, %cst {dimension_numbers = #tpu.dot_dimension_numbers<[1], [0], [0], [1], [0, 0, 1, 1], [], []>} : vector<8x128xf32>, vector<128x128xf32>, vector<8x128xf32> -> vector<8x128xf32>
    %c0_3 = arith.constant 0 : index
    %c0_4 = arith.constant 0 : index
    %3 = vector.load %arg3[%c0_3, %c0_4] : memref<128x128xf32, #tpu.memory_space<vmem>>, vector<128x128xf32>
    %cst_5 = arith.constant dense<0.000000e+00> : vector<8x128xf32>
    %4 = tpu.matmul %2, %3, %cst_5 {dimension_numbers = #tpu.dot_dimension_numbers<[1], [0], [0], [1], [0, 0, 1, 1], [], []>} : vector<8x128xf32>, vector<128x128xf32>, vector<8x128xf32> -> vector<8x128xf32>
    %c0_6 = arith.constant 0 : index
    %c0_7 = arith.constant 0 : index
    %5 = vector.load %arg4[%c0_6, %c0_7] : memref<8x128xf32, #tpu.memory_space<vmem>>, vector<8x128xf32>
    tpu.vector_store %arg4[%c0_6, %c0_7], %4 {strides = array<i32>} : memref<8x128xf32, #tpu.memory_space<vmem>>, vector<8x128xf32>,
    return
  }
  func.func @transform_0(%arg0: i32) -> (i32, i32) {
    %c0_i32 = arith.constant 0 : i32
    %c0_i32_0 = arith.constant 0 : i32
    return %arg0, %c0_i32 : i32, i32
  }
  func.func @transform_1(%arg0: i32) -> (i32, i32) {
    %c0_i32 = arith.constant 0 : i32
    %c0_i32_0 = arith.constant 0 : i32
    %c0_i32_1 = arith.constant 0 : i32
    return %c0_i32, %c0_i32_0 : i32, i32
  }
  func.func @transform_2(%arg0: i32) -> (i32, i32) {
    %c0_i32 = arith.constant 0 : i32
    %c0_i32_0 = arith.constant 0 : i32
    %c0_i32_1 = arith.constant 0 : i32
    return %c0_i32, %c0_i32_0 : i32, i32
  }
  func.func @transform_3(%arg0: i32) -> (i32, i32) {
    %c0_i32 = arith.constant 0 : i32
    %c0_i32_0 = arith.constant 0 : i32
    return %arg0, %c0_i32 : i32, i32
  }
}

module attributes {stable_mosaic.version = 11 : i64} {
  func.func @_kv_kernel(%arg0: i32, %arg1: i32, %arg2: memref<8x128xf32, #tpu.memory_space<vmem>>, %arg3: memref<128x128xf32, #tpu.memory_space<vmem>>, %arg4: memref<128x128xf32, #tpu.memory_space<vmem>>, %arg5: memref<1x128x128xf32, #tpu.memory_space<vmem>>) attributes {dimension_semantics = [#tpu.dimension_semantics<parallel>, #tpu.dimension_semantics<arbitrary>], iteration_bounds = array<i64: 1, 1>, scalar_prefetch = 0 : i64, scratch_operands = 0 : i64, tpu.core_type = #tpu.core_type<tc>, window_params = [{transform_indices = @transform_0, window_bounds = array<i64: 8, 128>}, {pipeline_mode = #tpu.pipeline_mode<synchronous>, transform_indices = @transform_1, window_bounds = array<i64: 128, 128>}, {pipeline_mode = #tpu.pipeline_mode<synchronous>, transform_indices = @transform_2, window_bounds = array<i64: 128, 128>}, {transform_indices = @transform_3, window_bounds = array<i64: 1, 128, 128>}]} {
    %c0_i32 = arith.constant 0 : i32
    %0 = arith.cmpi eq, %arg1, %c0_i32 : i32
    %1 = arith.extui %0 : i1 to i32
    %c0_i32_0 = arith.constant 0 : i32
    %2 = arith.cmpi ne, %1, %c0_i32_0 : i32
    scf.if %2 {
      %cst_14 = arith.constant 0.000000e+00 : f32
      %15 = vector.broadcast %cst_14 : f32 to vector<128x128xf32>
      %c0_15 = arith.constant 0 : index
      %c0_16 = arith.constant 0 : index
      %c0_17 = arith.constant 0 : index
      %16 = vector.load %arg5[%c0_15, %c0_16, %c0_17] : memref<1x128x128xf32, #tpu.memory_space<vmem>>, vector<1x128x128xf32>
      %17 = vector.shape_cast %16 : vector<1x128x128xf32> to vector<128x128xf32>
      %18 = vector.shape_cast %15 : vector<128x128xf32> to vector<1x128x128xf32>
      tpu.vector_store %arg5[%c0_15, %c0_16, %c0_17], %18 {strides = array<i32>} : memref<1x128x128xf32, #tpu.memory_space<vmem>>, vector<1x128x128xf32>,
    } else {
    }
    %c0 = arith.constant 0 : index
    %c0_1 = arith.constant 0 : index
    %3 = vector.load %arg2[%c0, %c0_1] : memref<8x128xf32, #tpu.memory_space<vmem>>, vector<8x128xf32>
    %c0_2 = arith.constant 0 : index
    %c0_3 = arith.constant 0 : index
    %4 = vector.load %arg3[%c0_2, %c0_3] : memref<128x128xf32, #tpu.memory_space<vmem>>, vector<128x128xf32>
    %cst = arith.constant dense<0.000000e+00> : vector<8x128xf32>
    %5 = tpu.matmul %3, %4, %cst {dimension_numbers = #tpu.dot_dimension_numbers<[1], [0], [0], [1], [0, 0, 1, 1], [], []>} : vector<8x128xf32>, vector<128x128xf32>, vector<8x128xf32> -> vector<8x128xf32>
    %c0_4 = arith.constant 0 : index
    %c0_5 = arith.constant 0 : index
    %6 = vector.load %arg4[%c0_4, %c0_5] : memref<128x128xf32, #tpu.memory_space<vmem>>, vector<128x128xf32>
    %cst_6 = arith.constant dense<0.000000e+00> : vector<8x128xf32>
    %7 = tpu.matmul %3, %6, %cst_6 {dimension_numbers = #tpu.dot_dimension_numbers<[1], [0], [0], [1], [0, 0, 1, 1], [], []>} : vector<8x128xf32>, vector<128x128xf32>, vector<8x128xf32> -> vector<8x128xf32>
    %c0_7 = arith.constant 0 : index
    %c0_8 = arith.constant 0 : index
    %c0_9 = arith.constant 0 : index
    %8 = vector.load %arg5[%c0_7, %c0_8, %c0_9] : memref<1x128x128xf32, #tpu.memory_space<vmem>>, vector<1x128x128xf32>
    %9 = vector.shape_cast %8 : vector<1x128x128xf32> to vector<128x128xf32>
    %cst_10 = arith.constant dense<0.000000e+00> : vector<128x128xf32>
    %10 = tpu.matmul %5, %7, %cst_10 {dimension_numbers = #tpu.dot_dimension_numbers<[0], [0], [1], [1], [0, 1, 1, 1], [], []>} : vector<8x128xf32>, vector<8x128xf32>, vector<128x128xf32> -> vector<128x128xf32>
    %11 = arith.addf %9, %10 : vector<128x128xf32>
    %c0_11 = arith.constant 0 : index
    %c0_12 = arith.constant 0 : index
    %c0_13 = arith.constant 0 : index
    %12 = vector.load %arg5[%c0_11, %c0_12, %c0_13] : memref<1x128x128xf32, #tpu.memory_space<vmem>>, vector<1x128x128xf32>
    %13 = vector.shape_cast %12 : vector<1x128x128xf32> to vector<128x128xf32>
    %14 = vector.shape_cast %11 : vector<128x128xf32> to vector<1x128x128xf32>
    tpu.vector_store %arg5[%c0_11, %c0_12, %c0_13], %14 {strides = array<i32>} : memref<1x128x128xf32, #tpu.memory_space<vmem>>, vector<1x128x128xf32>,
    return
  }
  func.func @transform_0(%arg0: i32, %arg1: i32) -> (i32, i32) {
    %c1_i32 = arith.constant 1 : i32
    %0 = arith.muli %arg0, %c1_i32 : i32
    %1 = arith.addi %0, %arg1 : i32
    %c0_i32 = arith.constant 0 : i32
    %c0_i32_0 = arith.constant 0 : i32
    return %1, %c0_i32 : i32, i32
  }
  func.func @transform_1(%arg0: i32, %arg1: i32) -> (i32, i32) {
    %c0_i32 = arith.constant 0 : i32
    %c0_i32_0 = arith.constant 0 : i32
    %c0_i32_1 = arith.constant 0 : i32
    return %c0_i32, %c0_i32_0 : i32, i32
  }
  func.func @transform_2(%arg0: i32, %arg1: i32) -> (i32, i32) {
    %c0_i32 = arith.constant 0 : i32
    %c0_i32_0 = arith.constant 0 : i32
    %c0_i32_1 = arith.constant 0 : i32
    return %c0_i32, %c0_i32_0 : i32, i32
  }
  func.func @transform_3(%arg0: i32, %arg1: i32) -> (i32, i32, i32) {
    %c0_i32 = arith.constant 0 : i32
    %c0_i32_0 = arith.constant 0 : i32
    %c0_i32_1 = arith.constant 0 : i32
    return %arg0, %c0_i32, %c0_i32_0 : i32, i32, i32
  }
}

</mosaic_0001>

<bundles_post_ra>
// kernel: self_attention_v2.3
= control target key start
LH: loop header
LB: loop body
LE: loop exit
PB: predicated region body
PF: predicated region fallthrough
CT: control target
= control target key end

     0   :  { %v383_v3 = vmov 0.0|0.0   ;;  %vm384_vm0 = vmmov 0   ;;  %v385_v6 = vmov 0.0   ;;  %s534_s0 = inlined_call_operand.vmem [shape: f32[8,128], index: 0, kind: input, shape index: {}]   ;;  %s535_s1 = inlined_call_operand.vmem [shape: f32[128,128], index: 1, kind: input, shape index: {}]   ;;  %s536_s2 = inlined_call_operand.vmem [shape: f32[128,128], index: 2, kind: input, shape index: {}]   ;;  %s537_s3 = inlined_call_operand.hbm [shape: f32[8,128], index: 3, kind: output, shape index: {}]  }
   0x1   :  { %v16_v0 = vld [vmem:[%s535_s1] sm:$0xff]  ;;  %v17_v1 = vld [vmem:[%s535_s1 + $0x8] sm:$0xff]  ;;  %v18_v2 = vld [vmem:[%s535_s1 + $0x10] sm:$0xff]  ;;  %307 = vmatprep.subr.bf16.mxu0 %v383_v3  ;;  %269 = vmatprep.mubr.msk.f32.mxu0 %vm384_vm0, %v385_v6 }
   0x2   :  { %v308_v4 = vpack.c.bf16 %v17_v1, %v16_v0  ;;  %v19_v5 = vld [vmem:[%s535_s1 + $0x18] sm:$0xff]  ;;  %331 = vmatprep.subr.bf16.mxu1 %v383_v3  ;;  %304 = vmatprep.mubr.msk.f32.mxu1 %vm384_vm0, %v385_v6  ;;  %v20_v8 = vld [vmem:[%s535_s1 + $0x20] sm:$0xff]  ;;  %v21_v9 = vld [vmem:[%s535_s1 + $0x28] sm:$0xff] }
   0x3   :  { %v311_v7 = vpack.c.bf16 %v19_v5, %v18_v2  ;;  %v102_v10 = vld [vmem:[%s536_s2] sm:$0xff]  ;;  %v103_v11 = vld [vmem:[%s536_s2 + $0x8] sm:$0xff]  ;;  %v104_v12 = vld [vmem:[%s536_s2 + $0x10] sm:$0xff]  ;;  %v314_v14 = vpack.c.bf16 %v21_v9, %v20_v8 }
   0x4   :  { %309 = vmatpush3.bf16.msra.mxu0 %v308_v4  ;;  %v105_v13 = vld [vmem:[%s536_s2 + $0x18] sm:$0xff]  ;;  %v332_v15 = vpack.c.bf16 %v103_v11, %v102_v10  ;;  %v22_v16 = vld [vmem:[%s535_s1 + $0x30] sm:$0xff]  ;;  %v106_v19 = vld [vmem:[%s536_s2 + $0x20] sm:$0xff] }
   0x5   :  { %310 = vmatprep.subr.bf16.mxu0 %v383_v3  ;;  %v23_v17 = vld [vmem:[%s535_s1 + $0x38] sm:$0xff]  ;;  %v335_v18 = vpack.c.bf16 %v105_v13, %v104_v12  ;;  %v107_v20 = vld [vmem:[%s536_s2 + $0x28] sm:$0xff] }
   0x6   :  { %333 = vmatpush3.bf16.msra.mxu1 %v332_v15  ;;  %v317_v21 = vpack.c.bf16 %v23_v17, %v22_v16 }
   0x7   :  { %334 = vmatprep.subr.bf16.mxu1 %v383_v3 }
   0x8   :  { %312 = vmatpush3.bf16.msra.mxu0 %v311_v7 }
   0x9   :  { %313 = vmatprep.subr.bf16.mxu0 %v383_v3 }
   0xc   :  { %315 = vmatpush3.bf16.msra.mxu0 %v314_v14 }
   0xd   :  { %8 = vsyncpa [#allocation3], 0  ;;  %316 = vmatprep.subr.bf16.mxu0 %v383_v3  ;;  %v24_v22 = vld [vmem:[%s535_s1 + $0x40] sm:$0xff]  ;;  %v25_v23 = vld [vmem:[%s535_s1 + $0x48] sm:$0xff]  ;;  %336 = vmatpush3.bf16.msra.mxu1 %v335_v18  ;;  %v338_v24 = vpack.c.bf16 %v107_v20, %v106_v19  ;;  %s386_s23 = smov [#allocation2]  }
   0xe   :  { %337 = vmatprep.subr.bf16.mxu1 %v383_v3  ;;  %v108_v25 = vld [vmem:[%s536_s2 + $0x30] sm:$0xff]  ;;  %v109_v26 = vld [vmem:[%s536_s2 + $0x38] sm:$0xff]  ;;  %v320_v27 = vpack.c.bf16 %v25_v23, %v24_v22  ;;  %v110_v31 = vld [vmem:[%s536_s2 + $0x40] sm:$0xff]  ;;  %s195_s24 = sshll.u32 %s386_s23, 4  ;;  %s196_s24 = int_to_ptr.vmem [resolvable:$true] %s195_s24 }
   0xf   :  { %v26_v28 = vld [vmem:[%s535_s1 + $0x50] sm:$0xff]  ;;  %v27_v29 = vld [vmem:[%s535_s1 + $0x58] sm:$0xff]  ;;  %v341_v30 = vpack.c.bf16 %v109_v26, %v108_v25  ;;  %v111_v32 = vld [vmem:[%s536_s2 + $0x48] sm:$0xff]  ;;  %p364_p1 = scmp.lt.s32.totalorder %s196_s24, %s196_s24 }
  0x10   :  { %318 = vmatpush3.bf16.msra.mxu0 %v317_v21  ;;  %v323_v33 = vpack.c.bf16 %v27_v29, %v26_v28  ;;  %v28_v34 = vld [vmem:[%s535_s1 + $0x60] sm:$0xff]  ;;  %v29_v35 = vld [vmem:[%s535_s1 + $0x68] sm:$0xff]  ;;  %v344_v36 = vpack.c.bf16 %v111_v32, %v110_v31  ;;  %v112_v37 = vld [vmem:[%s536_s2 + $0x50] sm:$0xff] }
  0x11   :  { %319 = vmatprep.subr.bf16.mxu0 %v383_v3  ;;  %339 = vmatpush3.bf16.msra.mxu1 %v338_v24  ;;  %v113_v38 = vld [vmem:[%s536_s2 + $0x58] sm:$0xff]  ;;  %v326_v39 = vpack.c.bf16 %v29_v35, %v28_v34  ;;  %v30_v40 = vld [vmem:[%s535_s1 + $0x70] sm:$0xff]  ;;  %v114_v43 = vld [vmem:[%s536_s2 + $0x60] sm:$0xff] }
  0x12   :  { %340 = vmatprep.subr.bf16.mxu1 %v383_v3  ;;  %v31_v41 = vld [vmem:[%s535_s1 + $0x78] sm:$0xff]  ;;  %v347_v42 = vpack.c.bf16 %v113_v38, %v112_v37  ;;  %v115_v44 = vld [vmem:[%s536_s2 + $0x68] sm:$0xff]  ;;  %v116_v47 = vld [vmem:[%s536_s2 + $0x70] sm:$0xff] }
  0x13   :  { %v329_v45 = vpack.c.bf16 %v31_v41, %v30_v40  ;;  %v350_v46 = vpack.c.bf16 %v115_v44, %v114_v43  ;;  %v117_v48 = vld [vmem:[%s536_s2 + $0x78] sm:$0xff]  ;;  %v15_v49 = vld [vmem:[%s534_s0] sm:$0xff]  ;;  %s359_s2 = scalar_lea.vmem %s196_s24, 128 }
  0x14   :  { %321 = vmatpush3.bf16.msra.mxu0 %v320_v27  ;;  %v353_v50 = vpack.c.bf16 %v117_v48, %v116_v47  ;;  %p360_p0 = scmp.ne.s32.totalorder %s196_s24, %s359_s2  ;;  %p365_p2 = scmp.lt.s32.totalorder %s359_s2, %s359_s2 }
  0x15   :  { %322 = vmatprep.subr.bf16.mxu0 %v383_v3  ;;  %342 = vmatpush3.bf16.msra.mxu1 %v341_v30 }
  0x16   :  { %343 = vmatprep.subr.bf16.mxu1 %v383_v3  ;;  %p366_p3 = por %p365_p2, %p364_p1 }
  0x18   :  { %324 = vmatpush3.bf16.msra.mxu0 %v323_v33  ;;  %p367_p4 = pnand %p366_p3, %p360_p0 }
  0x19   :  { %325 = vmatprep.subr.bf16.mxu0 %v383_v3  ;;  %345 = vmatpush3.bf16.msra.mxu1 %v344_v36 }
  0x1a   :  { %346 = vmatprep.subr.bf16.mxu1 %v383_v3 }
  0x1c   :  { %327 = vmatpush3.bf16.msra.mxu0 %v326_v39 }
  0x1d   :  { %328 = vmatprep.subr.bf16.mxu0 %v383_v3  ;;  %348 = vmatpush3.bf16.msra.mxu1 %v347_v42 }
  0x1e   :  { %349 = vmatprep.subr.bf16.mxu1 %v383_v3 }
  0x20   :  { %330 = vmatpush3.bf16.msra.mxu0 %v329_v45 }
  0x21   :  { %351 = vmatpush3.bf16.msra.mxu1 %v350_v46 }
  0x22   :  { %352 = vmatprep.subr.bf16.mxu1 %v383_v3 }
  0x23   :  { %270 = vmatmul.mubr.f32.vlgmr.msra.gmra.mrb[0].mxu0 %v15_v49 }
  0x25   :  { %354 = vmatpush3.bf16.msra.mxu1 %v353_v50 }
  0xf6   :  { %v98_v51 = vpop.f32.mrb[0].mxu0 }
  0xf7   :  { %v271_v52 = vpop.f32.mrb[1].mxu0  ;;  %305 = vmatmul.mubr.f32.vlgmr.msra.gmra.mrb[0].mxu1 %v98_v51 }
 0x1ca   :  { %v184_v53 = vpop.f32.mrb[0].mxu1 }
 0x1cb   :  { %188 = vst [vmem:[#allocation2] sm:$0xff] %v184_v53  ;;  %v306_v54 = vpop.f32.mrb[1].mxu1 }
 0x1cc   :  { %370 = shalt.err (!%p367_p4)
}
 0x1cd   :  { %s371_s26 = scalar_lea.hbm %s537_s3, 128 }
 0x1ce   :  { %p372_p5 = scmp.ne.s32.totalorder %s537_s3, %s371_s26  ;;  %p375_p6 = scmp.lt.u32.totalorder %s371_s26, %s537_s3 }
 0x1d0   :  { %p377_p7 = pnand %p375_p6, %p372_p5 }
 0x1d2   :  { %380 = shalt.err (!%p377_p7)
}
 0x1d3   :  { %198 = dma.vmem_to_hbm [thread:$0]  %s196_s24, 128, %s537_s3, [#allocation3]  }
 0x1d4   :  { %381 = dma.done.wait [#allocation3], 128  }
 0x1d5   :  { %382 = vsyncadd [#allocation3], 4294967168 }
 0x1d6   :  { %202 = vsyncpa [#allocation3], 1 }

// kernel: self_attention_v2.2
= control target key start
LH: loop header
LB: loop body
LE: loop exit
PB: predicated region body
PF: predicated region fallthrough
CT: control target
= control target key end

     0   :  { %v724_v0 = vmov 0.0|0.0   ;;  %vm725_vm0 = vmmov 0   ;;  %v726_v4 = vmov 0.0   ;;  %vm272_vm1 = vcmask 64512   ;;  %s926_s1 = inlined_call_operand.vmem [shape: f32[128,128], index: 1, kind: input, shape index: {}]   ;;  %s927_s2 = inlined_call_operand.vmem [shape: f32[128,128], index: 2, kind: input, shape index: {}]   ;;  %s928_s0 = inlined_call_operand.vmem [shape: f32[8,128], index: 0, kind: input, shape index: {}]   ;;  %s929_s3 = inlined_call_operand.vmem [shape: f32[1,128,128], index: 3, kind: output, shape index: {}]  }
   0x1   :  { %671 = vmatprep.subr.bf16.mxu0 %v724_v0  ;;  %v52_v1 = vld [vmem:[%s926_s1] sm:$0xff]  ;;  %v53_v2 = vld [vmem:[%s926_s1 + $0x8] sm:$0xff]  ;;  %v54_v3 = vld [vmem:[%s926_s1 + $0x10] sm:$0xff]  ;;  %607 = vmatprep.mubr.msk.f32.mxu0 %vm725_vm0, %v726_v4 }
   0x2   :  { %v672_v5 = vpack.c.bf16 %v53_v2, %v52_v1  ;;  %v55_v6 = vld [vmem:[%s926_s1 + $0x18] sm:$0xff]  ;;  %695 = vmatprep.subr.bf16.mxu1 %v724_v0  ;;  %642 = vmatprep.mubr.msk.f32.mxu1 %vm725_vm0, %v726_v4  ;;  %v56_v8 = vld [vmem:[%s926_s1 + $0x20] sm:$0xff]  ;;  %v57_v9 = vld [vmem:[%s926_s1 + $0x28] sm:$0xff] }
   0x3   :  { %v675_v7 = vpack.c.bf16 %v55_v6, %v54_v3  ;;  %v138_v10 = vld [vmem:[%s927_s2] sm:$0xff]  ;;  %v139_v11 = vld [vmem:[%s927_s2 + $0x8] sm:$0xff]  ;;  %v140_v12 = vld [vmem:[%s927_s2 + $0x10] sm:$0xff]  ;;  %v678_v14 = vpack.c.bf16 %v57_v9, %v56_v8 }
   0x4   :  { %673 = vmatpush3.bf16.msra.mxu0 %v672_v5  ;;  %v141_v13 = vld [vmem:[%s927_s2 + $0x18] sm:$0xff]  ;;  %v696_v15 = vpack.c.bf16 %v139_v11, %v138_v10  ;;  %v58_v16 = vld [vmem:[%s926_s1 + $0x30] sm:$0xff]  ;;  %v142_v19 = vld [vmem:[%s927_s2 + $0x20] sm:$0xff] }
   0x5   :  { %674 = vmatprep.subr.bf16.mxu0 %v724_v0  ;;  %v59_v17 = vld [vmem:[%s926_s1 + $0x38] sm:$0xff]  ;;  %v699_v18 = vpack.c.bf16 %v141_v13, %v140_v12  ;;  %v143_v20 = vld [vmem:[%s927_s2 + $0x28] sm:$0xff]  ;;  %v60_v22 = vld [vmem:[%s926_s1 + $0x40] sm:$0xff] }
   0x6   :  { %697 = vmatpush3.bf16.msra.mxu1 %v696_v15  ;;  %v681_v21 = vpack.c.bf16 %v59_v17, %v58_v16  ;;  %v61_v23 = vld [vmem:[%s926_s1 + $0x48] sm:$0xff]  ;;  %v702_v24 = vpack.c.bf16 %v143_v20, %v142_v19  ;;  %v144_v25 = vld [vmem:[%s927_s2 + $0x30] sm:$0xff]  ;;  %v145_v26 = vld [vmem:[%s927_s2 + $0x38] sm:$0xff] }
   0x7   :  { %698 = vmatprep.subr.bf16.mxu1 %v724_v0  ;;  %v684_v27 = vpack.c.bf16 %v61_v23, %v60_v22  ;;  %v62_v28 = vld [vmem:[%s926_s1 + $0x50] sm:$0xff]  ;;  %v63_v29 = vld [vmem:[%s926_s1 + $0x58] sm:$0xff]  ;;  %v705_v30 = vpack.c.bf16 %v145_v26, %v144_v25  ;;  %v146_v31 = vld [vmem:[%s927_s2 + $0x40] sm:$0xff] }
   0x8   :  { %676 = vmatpush3.bf16.msra.mxu0 %v675_v7  ;;  %v147_v32 = vld [vmem:[%s927_s2 + $0x48] sm:$0xff]  ;;  %v687_v33 = vpack.c.bf16 %v63_v29, %v62_v28  ;;  %v64_v34 = vld [vmem:[%s926_s1 + $0x60] sm:$0xff]  ;;  %v148_v37 = vld [vmem:[%s927_s2 + $0x50] sm:$0xff] }
   0x9   :  { %677 = vmatprep.subr.bf16.mxu0 %v724_v0  ;;  %v65_v35 = vld [vmem:[%s926_s1 + $0x68] sm:$0xff]  ;;  %v708_v36 = vpack.c.bf16 %v147_v32, %v146_v31  ;;  %v149_v38 = vld [vmem:[%s927_s2 + $0x58] sm:$0xff]  ;;  %v66_v40 = vld [vmem:[%s926_s1 + $0x70] sm:$0xff] }
   0xa   :  { %700 = vmatpush3.bf16.msra.mxu1 %v699_v18  ;;  %v690_v39 = vpack.c.bf16 %v65_v35, %v64_v34  ;;  %v67_v41 = vld [vmem:[%s926_s1 + $0x78] sm:$0xff]  ;;  %v711_v42 = vpack.c.bf16 %v149_v38, %v148_v37  ;;  %v150_v43 = vld [vmem:[%s927_s2 + $0x60] sm:$0xff]  ;;  %v151_v44 = vld [vmem:[%s927_s2 + $0x68] sm:$0xff] }
   0xb   :  { %701 = vmatprep.subr.bf16.mxu1 %v724_v0  ;;  %v693_v45 = vpack.c.bf16 %v67_v41, %v66_v40  ;;  %v714_v46 = vpack.c.bf16 %v151_v44, %v150_v43  ;;  %v152_v47 = vld [vmem:[%s927_s2 + $0x70] sm:$0xff]  ;;  %v153_v48 = vld [vmem:[%s927_s2 + $0x78] sm:$0xff]  ;;  %v51_v49 = vld [vmem:[%s928_s0] sm:$0xff] }
   0xc   :  { %679 = vmatpush3.bf16.msra.mxu0 %v678_v14  ;;  %v717_v50 = vpack.c.bf16 %v153_v48, %v152_v47 }
   0xd   :  { %680 = vmatprep.subr.bf16.mxu0 %v724_v0 }
   0xe   :  { %703 = vmatpush3.bf16.msra.mxu1 %v702_v24 }
   0xf   :  { %704 = vmatprep.subr.bf16.mxu1 %v724_v0 }
  0x10   :  { %682 = vmatpush3.bf16.msra.mxu0 %v681_v21 }
  0x11   :  { %683 = vmatprep.subr.bf16.mxu0 %v724_v0 }
  0x12   :  { %706 = vmatpush3.bf16.msra.mxu1 %v705_v30 }
  0x13   :  { %707 = vmatprep.subr.bf16.mxu1 %v724_v0 }
  0x14   :  { %685 = vmatpush3.bf16.msra.mxu0 %v684_v27 }
  0x15   :  { %686 = vmatprep.subr.bf16.mxu0 %v724_v0 }
  0x16   :  { %709 = vmatpush3.bf16.msra.mxu1 %v708_v36 }
  0x17   :  { %710 = vmatprep.subr.bf16.mxu1 %v724_v0 }
  0x18   :  { %688 = vmatpush3.bf16.msra.mxu0 %v687_v33 }
  0x19   :  { %689 = vmatprep.subr.bf16.mxu0 %v724_v0 }
  0x1a   :  { %712 = vmatpush3.bf16.msra.mxu1 %v711_v42 }
  0x1b   :  { %713 = vmatprep.subr.bf16.mxu1 %v724_v0 }
  0x1c   :  { %691 = vmatpush3.bf16.msra.mxu0 %v690_v39 }
  0x1d   :  { %692 = vmatprep.subr.bf16.mxu0 %v724_v0 }
  0x1e   :  { %715 = vmatpush3.bf16.msra.mxu1 %v714_v46 }
  0x1f   :  { %716 = vmatprep.subr.bf16.mxu1 %v724_v0 }
  0x20   :  { %694 = vmatpush3.bf16.msra.mxu0 %v693_v45 }
  0x22   :  { %718 = vmatpush3.bf16.msra.mxu1 %v717_v50 }
  0x23   :  { %608 = vmatmul.mubr.f32.vlgmr.msra.gmra.mrb[0].mxu0 %v51_v49 }
  0x25   :  { %643 = vmatmul.mubr.f32.vlgmr.msra.gmra.mrb[0].mxu1 %v51_v49 }
  0xf6   :  { %v134_v51 = vpop.f32.mrb[0].mxu0 }
  0xf7   :  { %240 = vxpose.xlu0.b32.start.end [1/1] (short) %v134_v51, 128  ;;  %v609_v52 = vpop.f32.mrb[1].mxu0 }
  0xf8   :  { %v220_v53 = vpop.f32.mrb[0].mxu1 }
  0xf9   :  { %645 = vmatprep.subr.mxu0 %v220_v53  ;;  %719 = vmatprep.subr.mxu1 %v220_v53  ;;  %v644_v54 = vpop.f32.mrb[1].mxu1 }
  0xfa   :  { %646 = vmatpush3.msra.mxu0 %v220_v53  ;;  %720 = vmatpush3.msra.mxu1 %v220_v53 }
 0x177   :  { %v256_v55 = vpop.trf.xlu0 }
 0x178   :  { %647 = vmatprep.mubr.msk.f32.mxu0 %vm272_vm1, %v256_v55 }
 0x17b   :  { %v257_v56 = vpop.trf.xlu0 }
 0x17c   :  { %648 = vmatmul.mubr.msk.f32.vlgmr.msra.gmra.mrb[2].mxu0 %vm272_vm1, %v257_v56 }
 0x17f   :  { %v258_v57 = vpop.trf.xlu0 }
 0x180   :  { %650 = vmatprep.mubr.msk.f32.mxu0 %vm272_vm1, %v258_v57 }
 0x183   :  { %v259_v58 = vpop.trf.xlu0 }
 0x184   :  { %651 = vmatmul.mubr.msk.f32.gmra.mrb[4].mxu0 %vm272_vm1, %v259_v58 }
 0x187   :  { %v260_v59 = vpop.trf.xlu0 }
 0x188   :  { %653 = vmatprep.mubr.msk.f32.mxu0 %vm272_vm1, %v260_v59 }
 0x18b   :  { %v261_v60 = vpop.trf.xlu0 }
 0x18c   :  { %654 = vmatmul.mubr.msk.f32.gmra.mrb[6].mxu0 %vm272_vm1, %v261_v60 }
 0x18f   :  { %v262_v61 = vpop.trf.xlu0 }
 0x190   :  { %656 = vmatprep.mubr.msk.f32.mxu0 %vm272_vm1, %v262_v61 }
 0x193   :  { %v263_v62 = vpop.trf.xlu0 }
 0x194   :  { %657 = vmatmul.mubr.msk.f32.gmra.mrb[8].mxu0 %vm272_vm1, %v263_v62 }
 0x197   :  { %v264_v63 = vpop.trf.xlu0 }
 0x198   :  { %659 = vmatprep.mubr.msk.f32.mxu1 %vm272_vm1, %v264_v63 }
 0x19b   :  { %v265_v0 = vpop.trf.xlu0 }
 0x19c   :  { %660 = vmatmul.mubr.msk.f32.vlgmr.msra.gmra.mrb[2].mxu1 %vm272_vm1, %v265_v0 }
 0x19f   :  { %v266_v1 = vpop.trf.xlu0 }
 0x1a0   :  { %662 = vmatprep.mubr.msk.f32.mxu1 %vm272_vm1, %v266_v1 }
 0x1a3   :  { %v267_v2 = vpop.trf.xlu0 }
 0x1a4   :  { %663 = vmatmul.mubr.msk.f32.gmra.mrb[4].mxu1 %vm272_vm1, %v267_v2 }
 0x1a7   :  { %v268_v3 = vpop.trf.xlu0 }
 0x1a8   :  { %665 = vmatprep.mubr.msk.f32.mxu1 %vm272_vm1, %v268_v3 }
 0x1ab   :  { %v269_v4 = vpop.trf.xlu0 }
 0x1ac   :  { %666 = vmatmul.mubr.msk.f32.gmra.mrb[6].mxu1 %vm272_vm1, %v269_v4 }
 0x1af   :  { %v270_v5 = vpop.trf.xlu0 }
 0x1b0   :  { %668 = vmatprep.mubr.msk.f32.mxu1 %vm272_vm1, %v270_v5 }
 0x1b3   :  { %v271_v6 = vpop.trf.xlu0 }
 0x1b4   :  { %669 = vmatmul.mubr.msk.f32.gmra.mrb[8].mxu1 %vm272_vm1, %v271_v6 }
 0x24f   :  { %v649_v7 = vpop.f32.mrb[2].mxu0 }
 0x250   :  { %v387_v8 = vpop.f32.mrb[3].mxu0  ;;  %483 = vst [vmem:[%s929_s3 + $0x8] sm:$0xff] %v649_v7 }
 0x251   :  { %482 = vst [vmem:[%s929_s3] sm:$0xff] %v387_v8 }
 0x257   :  { %v652_v9 = vpop.f32.mrb[4].mxu0 }
 0x258   :  { %v397_v10 = vpop.f32.mrb[5].mxu0  ;;  %485 = vst [vmem:[%s929_s3 + $0x18] sm:$0xff] %v652_v9 }
 0x259   :  { %484 = vst [vmem:[%s929_s3 + $0x10] sm:$0xff] %v397_v10 }
 0x25f   :  { %v655_v11 = vpop.f32.mrb[6].mxu0 }
 0x260   :  { %v407_v12 = vpop.f32.mrb[7].mxu0  ;;  %487 = vst [vmem:[%s929_s3 + $0x28] sm:$0xff] %v655_v11 }
 0x261   :  { %486 = vst [vmem:[%s929_s3 + $0x20] sm:$0xff] %v407_v12 }
 0x267   :  { %v658_v13 = vpop.f32.mrb[8].mxu0 }
 0x268   :  { %v417_v14 = vpop.f32.mrb[9].mxu0  ;;  %489 = vst [vmem:[%s929_s3 + $0x38] sm:$0xff] %v658_v13 }
 0x269   :  { %488 = vst [vmem:[%s929_s3 + $0x30] sm:$0xff] %v417_v14 }
 0x26f   :  { %v661_v15 = vpop.f32.mrb[2].mxu1 }
 0x270   :  { %v427_v16 = vpop.f32.mrb[3].mxu1  ;;  %491 = vst [vmem:[%s929_s3 + $0x48] sm:$0xff] %v661_v15 }
 0x271   :  { %490 = vst [vmem:[%s929_s3 + $0x40] sm:$0xff] %v427_v16 }
 0x277   :  { %v664_v17 = vpop.f32.mrb[4].mxu1 }
 0x278   :  { %v437_v18 = vpop.f32.mrb[5].mxu1  ;;  %493 = vst [vmem:[%s929_s3 + $0x58] sm:$0xff] %v664_v17 }
 0x279   :  { %492 = vst [vmem:[%s929_s3 + $0x50] sm:$0xff] %v437_v18 }
 0x27f   :  { %v667_v19 = vpop.f32.mrb[6].mxu1 }
 0x280   :  { %v447_v20 = vpop.f32.mrb[7].mxu1  ;;  %495 = vst [vmem:[%s929_s3 + $0x68] sm:$0xff] %v667_v19 }
 0x281   :  { %494 = vst [vmem:[%s929_s3 + $0x60] sm:$0xff] %v447_v20 }
 0x287   :  { %v670_v21 = vpop.f32.mrb[8].mxu1 }
 0x288   :  { %v457_v22 = vpop.f32.mrb[9].mxu1  ;;  %497 = vst [vmem:[%s929_s3 + $0x78] sm:$0xff] %v670_v21 }
 0x289   :  { %496 = vst [vmem:[%s929_s3 + $0x70] sm:$0xff] %v457_v22 }

</bundles_post_ra>
